<compile_context>
chip_gen: v7x
topology: tpu7x:2x2x1
jax: 0.10.0
libtpu: 0.0.40
codegen_flags: <defaults>
</compile_context>

<pallas_src>
import jax
import jax.numpy as jnp
from jax.experimental import pallas as pl
from jax.experimental.pallas import tpu as pltpu


# ----------------------------- Pallas kernel -----------------------------

def _zeroconv_kernel(x_ref, w_ref, b_ref, o_ref):
    # x: (TM, Cin), w: (Cin, Cout), b: (1, Cout) -> o: (TM, Cout)
    acc = jnp.dot(x_ref[...], w_ref[...], preferred_element_type=jnp.float32)
    o_ref[...] = (acc + b_ref[...].astype(jnp.float32)).astype(o_ref.dtype)


# ----------------------------- host wrapper ------------------------------

def _row_tile(M: int) -> int:
    # Largest convenient row tile: full array if small, else 512 (multiple of 8
    # sublanes; partial final blocks are padded/masked by Pallas).
    return M if M <= 512 else 512


def zeroconv_forward(x, w_t, b):
    """x: (B, L, C), w_t: (Cin, Cout) (already transposed), b: (1, Cout)."""
    B, L, C = x.shape
    Cout = w_t.shape[1]
    M = B * L
    x2 = x.reshape(M, C)

    TM = _row_tile(M)
    grid = (pl.cdiv(M, TM),)

    out2 = pl.pallas_call(
        _zeroconv_kernel,
        out_shape=jax.ShapeDtypeStruct((M, Cout), x.dtype),
        grid=grid,
        in_specs=[
            pl.BlockSpec((TM, C), lambda i: (i, 0)),      # row-tiled activations
            pl.BlockSpec((C, Cout), lambda i: (0, 0)),    # weight resident in VMEM
            pl.BlockSpec((1, Cout), lambda i: (0, 0)),    # bias resident in VMEM
        ],
        out_specs=pl.BlockSpec((TM, Cout), lambda i: (i, 0)),
        compiler_params=pltpu.CompilerParams(
            dimension_semantics=("parallel",),            # megacore sharding on v7x
            vmem_limit_bytes=64 * 1024 * 1024,
        ),
    )(x2, w_t, b)
    return out2.reshape(B, L, Cout)


class ZeroConvPallas:
    """Pallas equivalent of `zeroconv`: Conv1d(embed_dim, embed_dim, 1) over (B, L, C)."""

    def __init__(self, embed_dim, key=None):
        self.embed_dim = embed_dim
        key = jax.random.PRNGKey(0) if key is None else key
        kw, kb = jax.random.split(key, 2)
        # nn.Conv1d default init: uniform(-1/sqrt(fan_in), 1/sqrt(fan_in)),
        # fan_in = embed_dim * kernel_size = embed_dim.
        # NOTE: in ControlNet-style usage this conv is zero-initialized; random
        # init is used here so the correctness check is non-trivial.
        bound = 1.0 / (embed_dim ** 0.5)
        # PyTorch weight is (Cout, Cin, 1); we store it pre-transposed (Cin, Cout)
        # so the kernel computes x @ w_t + b directly.
        w = jax.random.uniform(kw, (embed_dim, embed_dim), jnp.float32,
                               minval=-bound, maxval=bound)   # (Cout, Cin)
        self.w = w
        self.w_t = jnp.asarray(w.T)                           # (Cin, Cout)
        self.b = jax.random.uniform(kb, (1, embed_dim), jnp.float32,
                                    minval=-bound, maxval=bound)

    def __call__(self, x):
        # PyTorch: conv(x.transpose(1,2)).transpose(1,2)  ==  x @ W.T + b
        return zeroconv_forward(x, self.w_t, self.b)


# ------------------------------ reference --------------------------------

def _reference(mod, x):
    B, L, C = x.shape
    return (x.reshape(-1, C) @ mod.w.T + mod.b).reshape(B, L, C)


if __name__ == "__main__":
    key = jax.random.PRNGKey(0)
    kx, kp, kx2 = jax.random.split(key, 3)

    # Small test consistent with the module layout (B, L, C).
    B, L, C = 2, 16, 32
    x = jax.random.normal(kx, (B, L, C), jnp.float32)

    mod = ZeroConvPallas(embed_dim=C, key=kp)
    out = jax.block_until_ready(mod(x))
    ref = _reference(mod, x)
    assert out.shape == (B, L, C)
    assert jnp.allclose(out, ref, atol=1e-4, rtol=1e-4), "mismatch vs reference"

    # Second check exercising the row-tiled grid (M > tile, partial last block).
    B2, L2 = 4, 200          # M = 800 -> grid of 2 steps with a padded tail
    x2 = jax.random.normal(kx2, (B2, L2, C), jnp.float32)
    out2 = jax.block_until_ready(mod(x2))
    ref2 = _reference(mod, x2)
    assert jnp.allclose(out2, ref2, atol=1e-4, rtol=1e-4), "tiled mismatch vs reference"

    print("KERNEL_OK")
</pallas_src>

<mosaic_0001>
module attributes {stable_mosaic.version = 11 : i64} {
  func.func @_zeroconv_kernel(%arg0: i32, %arg1: memref<32x32xf32, #tpu.memory_space<vmem>>, %arg2: memref<32x32xf32, #tpu.memory_space<vmem>>, %arg3: memref<1x32xf32, #tpu.memory_space<vmem>>, %arg4: memref<32x32xf32, #tpu.memory_space<vmem>>) attributes {dimension_semantics = [#tpu.dimension_semantics<parallel>], iteration_bounds = array<i64: 1>, scalar_prefetch = 0 : i64, scratch_operands = 0 : i64, tpu.core_type = #tpu.core_type<tc>, window_params = [{transform_indices = @transform_0, window_bounds = array<i64: 32, 32>}, {pipeline_mode = #tpu.pipeline_mode<synchronous>, transform_indices = @transform_1, window_bounds = array<i64: 32, 32>}, {pipeline_mode = #tpu.pipeline_mode<synchronous>, transform_indices = @transform_2, window_bounds = array<i64: 1, 32>}, {transform_indices = @transform_3, window_bounds = array<i64: 32, 32>}]} {
    %c0 = arith.constant 0 : index
    %c0_0 = arith.constant 0 : index
    %0 = vector.load %arg1[%c0, %c0_0] : memref<32x32xf32, #tpu.memory_space<vmem>>, vector<32x32xf32>
    %c0_1 = arith.constant 0 : index
    %c0_2 = arith.constant 0 : index
    %1 = vector.load %arg2[%c0_1, %c0_2] : memref<32x32xf32, #tpu.memory_space<vmem>>, vector<32x32xf32>
    %cst = arith.constant dense<0.000000e+00> : vector<32x32xf32>
    %2 = tpu.matmul %0, %1, %cst {dimension_numbers = #tpu.dot_dimension_numbers<[1], [0], [0], [1], [0, 0, 1, 1], [], []>} : vector<32x32xf32>, vector<32x32xf32>, vector<32x32xf32> -> vector<32x32xf32>
    %c0_3 = arith.constant 0 : index
    %c0_4 = arith.constant 0 : index
    %3 = vector.load %arg3[%c0_3, %c0_4] : memref<1x32xf32, #tpu.memory_space<vmem>>, vector<1x32xf32>
    %4 = vector.broadcast %3 : vector<1x32xf32> to vector<32x32xf32>
    %5 = arith.addf %2, %4 : vector<32x32xf32>
    %c0_5 = arith.constant 0 : index
    %c0_6 = arith.constant 0 : index
    %6 = vector.load %arg4[%c0_5, %c0_6] : memref<32x32xf32, #tpu.memory_space<vmem>>, vector<32x32xf32>
    tpu.vector_store %arg4[%c0_5, %c0_6], %5 {strides = array<i32>} : memref<32x32xf32, #tpu.memory_space<vmem>>, vector<32x32xf32>,
    return
  }
  func.func @transform_0(%arg0: i32) -> (i32, i32) {
    %c0_i32 = arith.constant 0 : i32
    %c0_i32_0 = arith.constant 0 : i32
    return %arg0, %c0_i32 : i32, i32
  }
  func.func @transform_1(%arg0: i32) -> (i32, i32) {
    %c0_i32 = arith.constant 0 : i32
    %c0_i32_0 = arith.constant 0 : i32
    %c0_i32_1 = arith.constant 0 : i32
    return %c0_i32, %c0_i32_0 : i32, i32
  }
  func.func @transform_2(%arg0: i32) -> (i32, i32) {
    %c0_i32 = arith.constant 0 : i32
    %c0_i32_0 = arith.constant 0 : i32
    %c0_i32_1 = arith.constant 0 : i32
    return %c0_i32, %c0_i32_0 : i32, i32
  }
  func.func @transform_3(%arg0: i32) -> (i32, i32) {
    %c0_i32 = arith.constant 0 : i32
    %c0_i32_0 = arith.constant 0 : i32
    return %arg0, %c0_i32 : i32, i32
  }
}

</mosaic_0001>

<bundles_post_ra>
// kernel: tpu_custom_call.1
= control target key start
LH: loop header
LB: loop body
LE: loop exit
PB: predicated region body
PF: predicated region fallthrough
CT: control target
= control target key end

     0   :  { %8 = vsyncpa [#allocation3], 0  ;;  %s426_s0 = inlined_call_operand.hbm [shape: f32[32,32], index: 0, kind: input, shape index: {}]   ;;  %s427_s1 = inlined_call_operand.hbm [shape: f32[32,32], index: 1, kind: input, shape index: {}]   ;;  %s428_s2 = inlined_call_operand.hbm [shape: f32[1,32], index: 2, kind: input, shape index: {}]   ;;  %s429_s3 = inlined_call_operand.hbm [shape: f32[32,32], index: 3, kind: output, shape index: {}]  }
   0x1   :  { %9 = vsyncpa [#allocation6], 0 }
   0x2   :  { %10 = vsyncpa [#allocation4], 0  ;;  %s328_s12 = smov [#allocation5]   ;;  %s329_s14 = smov [#allocation2]  }
   0x3   :  { %s28_s13 = sshll.u32 %s328_s12, 4  ;;  %s16_s15 = sshll.u32 %s329_s14, 4  ;;  %s29_s13 = int_to_ptr.vmem [resolvable:$true] %s28_s13  ;;  %s354_s15 = int_to_ptr.vmem [resolvable:$true] %s16_s15 }
   0x4   :  { %s234_s18 = scalar_lea.hbm %s427_s1, 512 }
   0x5   :  { %p235_p0 = scmp.ne.s32.totalorder %s427_s1, %s234_s18  ;;  %p238_p1 = scmp.lt.u32.totalorder %s234_s18, %s427_s1 }
   0x7   :  { %p240_p2 = pnand %p238_p1, %p235_p0 }
   0x9   :  { %243 = shalt.err (!%p240_p2)
}
   0xa   :  { %s244_s23 = scalar_lea.vmem %s29_s13, 512  ;;  %p249_p4 = scmp.lt.s32.totalorder %s29_s13, %s29_s13 }
   0xb   :  { %p245_p3 = scmp.ne.s32.totalorder %s29_s13, %s244_s23  ;;  %p250_p5 = scmp.lt.s32.totalorder %s244_s23, %s244_s23 }
   0xd   :  { %p251_p6 = por %p250_p5, %p249_p4 }
   0xf   :  { %p252_p7 = pnand %p251_p6, %p245_p3 }
  0x11   :  { %255 = shalt.err (!%p252_p7)
}
  0x12   :  { %s330_s24 = smov 128   ;;  %s331_s25 = smov 8  }
  0x13   :  { %34 = dma.hbm_to_vmem [thread:$0]  %s427_s1, 512, %s29_s13, [#allocation6], %s330_s24, %s330_s24, %s331_s25  }
  0x14   :  { %s256_s30 = scalar_lea.hbm %s426_s0, 512 }
  0x15   :  { %p257_p8 = scmp.ne.s32.totalorder %s426_s0, %s256_s30  ;;  %p260_p9 = scmp.lt.u32.totalorder %s256_s30, %s426_s0 }
  0x17   :  { %p262_p10 = pnand %p260_p9, %p257_p8 }
  0x19   :  { %265 = shalt.err (!%p262_p10)
}
  0x1a   :  { %s266_s8 = scalar_lea.vmem %s354_s15, 512  ;;  %p271_p12 = scmp.lt.s32.totalorder %s354_s15, %s354_s15 }
  0x1b   :  { %p267_p11 = scmp.ne.s32.totalorder %s354_s15, %s266_s8  ;;  %p272_p13 = scmp.lt.s32.totalorder %s266_s8, %s266_s8 }
  0x1d   :  { %p273_p0 = por %p272_p13, %p271_p12 }
  0x1f   :  { %p274_p1 = pnand %p273_p0, %p267_p11 }
  0x21   :  { %277 = shalt.err (!%p274_p1)
}
  0x22   :  { %22 = dma.hbm_to_vmem [thread:$0]  %s426_s0, 512, %s354_s15, [#allocation3], %s330_s24, %s330_s24, %s331_s25  }
  0x23   :  { %s332_s10 = smov [#allocation7]   ;;  %s278_s14 = scalar_lea.hbm %s428_s2, 16 }
  0x24   :  { %s41_s11 = sshll.u32 %s332_s10, 4  ;;  %p279_p2 = scmp.ne.s32.totalorder %s428_s2, %s278_s14  ;;  %s42_s11 = int_to_ptr.vmem [resolvable:$true] %s41_s11 }
  0x25   :  { %p282_p3 = scmp.lt.u32.totalorder %s278_s14, %s428_s2 }
  0x27   :  { %p284_p4 = pnand %p282_p3, %p279_p2 }
  0x29   :  { %287 = shalt.err (!%p284_p4)
}
  0x2a   :  { %s288_s20 = scalar_lea.vmem %s42_s11, 16  ;;  %s292_s0 = scalar_lea.vmem %s42_s11, 32 }
  0x2b   :  { %p289_p5 = scmp.ne.s32.totalorder %s42_s11, %s288_s20  ;;  %p293_p6 = scmp.lt.s32.totalorder %s42_s11, %s42_s11 }
  0x2c   :  { %p294_p7 = scmp.lt.s32.totalorder %s292_s0, %s288_s20 }
  0x2e   :  { %p295_p8 = por %p294_p7, %p293_p6 }
  0x30   :  { %p296_p9 = pnand %p295_p8, %p289_p5 }
  0x32   :  { %299 = shalt.err (!%p296_p9)
}
  0x33   :  { %44 = dma.hbm_to_vmem [thread:$0]  %s428_s2, 16, %s42_s11, [#allocation6]  }
  0x34   :  { %322 = dma.done.wait [#allocation3], 512  }
  0x35   :  { %323 = vsyncadd [#allocation3], 4294966784 }
  0x36   :  { %324 = dma.done.wait [#allocation6], 528  }
  0x37   :  { %325 = vsyncadd [#allocation6], 4294966768  ;;  %vm69_vm0 = vcmask 261120   ;;  %v58_v0 = vld [vmem:[#allocation5] sm:$0xff]  ;;  %v59_v1 = vld [vmem:[#allocation5 + $0x8] sm:$0xff]  ;;  %s333_s2 = smov [#allocation8]  }
  0x38   :  { %v60_v2 = vld [vmem:[#allocation5 + $0x10] sm:$0xff]  ;;  %v216_v3 = vpack.c.bf16 %v59_v1, %v58_v0  ;;  %v61_v4 = vld [vmem:[#allocation5 + $0x18] sm:$0xff]  ;;  %v54_v5 = vld [vmem:[#allocation2] sm:$0xff]  ;;  %s176_s22 = sshll.u32 %s333_s2, 4  ;;  %s177_s22 = int_to_ptr.vmem [resolvable:$true] %s176_s22 }
  0x39   :  { %v56_v6 = vld [vmem:[#allocation2 + $0x10] sm:$0xff]  ;;  %v220_v7 = vpack.c.bf16 %v61_v4, %v60_v2  ;;  %210 = vmatprep.mubr.msk.f32.mxu0 %vm69_vm0, %v54_v5  ;;  %v55_v8 = vld [vmem:[#allocation2 + $0x8] sm:$0xff]  ;;  %v57_v9 = vld [vmem:[#allocation2 + $0x18] sm:$0xff]  ;;  %s300_s23 = scalar_lea.vmem %s177_s22, 512  ;;  %p305_p11 = scmp.lt.s32.totalorder %s177_s22, %s177_s22 }
  0x3a   :  { %213 = vmatprep.mubr.msk.f32.mxu1 %vm69_vm0, %v56_v6  ;;  %217 = vmatprep.subr.bf16.mxu0 %v216_v3  ;;  %v189_v10 = vld [vmem:[#allocation7] ss:$0 sm:$0xff]  ;;  %p301_p10 = scmp.ne.s32.totalorder %s177_s22, %s300_s23  ;;  %p306_p12 = scmp.lt.s32.totalorder %s300_s23, %s300_s23 }
  0x3b   :  { %224 = vmatprep.subr.bf16.mxu1 %v216_v3  ;;  %219 = vmatpush3.bf16.msra.mxu0 %v216_v3 }
  0x3c   :  { %226 = vmatpush3.bf16.msra.mxu1 %v216_v3  ;;  %221 = vmatprep.subr.bf16.mxu0 %v220_v7  ;;  %p307_p13 = por %p306_p12, %p305_p11 }
  0x3d   :  { %225 = vmatprep.subr.bf16.mxu1 %v220_v7 }
  0x3e   :  { %p308_p0 = pnand %p307_p13, %p301_p10 }
  0x3f   :  { %223 = vmatpush3.bf16.msra.mxu0 %v220_v7 }
  0x40   :  { %227 = vmatpush3.bf16.msra.mxu1 %v220_v7 }
  0x42   :  { %211 = vmatmul.mubr.msk.f32.vlgmr.msra.gmra.mrb[0].mxu0 %vm69_vm0, %v55_v8 }
  0x43   :  { %214 = vmatmul.mubr.msk.f32.vlgmr.msra.gmra.mrb[0].mxu1 %vm69_vm0, %v57_v9 }
 0x115   :  { %v212_v11 = vpop.f32.mrb[0].mxu0 }
 0x116   :  { %v215_v12 = vpop.f32.mrb[0].mxu1  ;;  %v154_v13 = vadd.f32 %v212_v11, %v189_v10  ;;  %v148_v15 = vpop.f32.mrb[1].mxu0 }
 0x117   :  { %v164_v14 = vadd.f32 %v215_v12, %v189_v10  ;;  %v158_v16 = vpop.f32.mrb[1].mxu1  ;;  %v149_v17 = vadd.f32 %v189_v10, %v148_v15 }
 0x118   :  { %v159_v18 = vadd.f32 %v189_v10, %v158_v16  ;;  %168 = vst.msk [vmem:[#allocation8 + $0x8] sm:$0xff] %vm69_vm0, %v154_v13 }
 0x119   :  { %170 = vst.msk [vmem:[#allocation8 + $0x18] sm:$0xff] %vm69_vm0, %v164_v14  ;;  %167 = vst.msk [vmem:[#allocation8] sm:$0xff] %vm69_vm0, %v149_v17 }
 0x11a   :  { %169 = vst.msk [vmem:[#allocation8 + $0x10] sm:$0xff] %vm69_vm0, %v159_v18 }
 0x11b   :  { %311 = shalt.err (!%p308_p0)
}
 0x11c   :  { %s312_s28 = scalar_lea.hbm %s429_s3, 512 }
 0x11d   :  { %p313_p1 = scmp.ne.s32.totalorder %s429_s3, %s312_s28  ;;  %p316_p2 = scmp.lt.u32.totalorder %s312_s28, %s429_s3 }
 0x11f   :  { %p318_p3 = pnand %p316_p2, %p313_p1 }
 0x121   :  { %321 = shalt.err (!%p318_p3)
}
 0x122   :  { %182 = dma.vmem_to_hbm [thread:$0]  %s177_s22, 512, %s429_s3, [#allocation4], %s330_s24, %s330_s24, %s331_s25  }
 0x123   :  { %326 = dma.done.wait [#allocation4], 512  }
 0x124   :  { %327 = vsyncadd [#allocation4], 4294966784 }
 0x125   :  { %186 = vsyncpa [#allocation3], 1 }
 0x126   :  { %187 = vsyncpa [#allocation6], 1 }
 0x127   :  { %188 = vsyncpa [#allocation4], 1 }

</bundles_post_ra>
